<compile_context>
chip_gen: v7x
topology: tpu7x:2x2x1
jax: 0.10.0
libtpu: 0.0.40
codegen_flags: <defaults>
</compile_context>

<pallas_src>
import jax
import jax.numpy as jnp
from jax.experimental import pallas as pl
from jax.experimental.pallas import tpu as pltpu

D_MODEL = 768
MAXLEN = 52
LN_EPS = 1e-5                 # torch.nn.LayerNorm default
_TARGET_TILE_ROWS = 1024      # ~3 MiB of f32 activation rows per VMEM tile


# ---------------------------------------------------------------------------
# Pallas kernel: fused (token_emb + pos_emb) add + LayerNorm over d_model
# ---------------------------------------------------------------------------
def _embed_add_ln_kernel(tok_ref, pos_ref, g_ref, b_ref, o_ref):
    # tok_ref: (bt, S, D)   pos_ref: (S, D)   g_ref/b_ref: (1, D)   o_ref: (bt, S, D)
    x = tok_ref[...].astype(jnp.float32) + pos_ref[...].astype(jnp.float32)
    mean = jnp.mean(x, axis=-1, keepdims=True)
    c = x - mean
    var = jnp.mean(c * c, axis=-1, keepdims=True)
    y = c * jax.lax.rsqrt(var + LN_EPS)          # EUP rsqrt, off the VALU critical path
    y = y * g_ref[...].astype(jnp.float32) + b_ref[...].astype(jnp.float32)
    o_ref[...] = y.astype(o_ref.dtype)


def _pick_batch_tile(B, S):
    """Group batch rows toward ~_TARGET_TILE_ROWS per tile, keep >=2 grid steps
    when B >= 2 so both v7x TensorCores get work, and keep bt | B."""
    bt = max(1, min(max(B // 2, 1), max(_TARGET_TILE_ROWS // S, 1)))
    while B % bt:
        bt -= 1
    return bt


def fused_embed_add_layernorm(tok, pos, gamma, beta):
    """LayerNorm(tok + pos) over the last dim.

    tok:   (B, S, D) gathered token embeddings
    pos:   (S, D)    positional embedding rows 0..S-1 (broadcast over batch in VMEM)
    gamma: (D,)      LayerNorm weight
    beta:  (D,)      LayerNorm bias
    """
    B, S, D = tok.shape
    assert pos.shape == (S, D)

    bt = _pick_batch_tile(B, S)
    grid = (B // bt,)

    # Explicit scoped-VMEM budget: double-buffered tok/out tiles, the pos tile,
    # params and f32 temporaries, with headroom (v7x: 64 MiB physical VMEM).
    tile_bytes = bt * S * D * 4
    vmem_limit = int(min(64 * 1024 * 1024, max(16 * 1024 * 1024, 8 * tile_bytes)))

    cost = pl.CostEstimate(
        flops=10 * B * S * D,
        transcendentals=B * S,
        bytes_accessed=(2 * B * S * D + S * D + 2 * D) * 4,
    )

    return pl.pallas_call(
        _embed_add_ln_kernel,
        out_shape=jax.ShapeDtypeStruct((B, S, D), tok.dtype),
        grid_spec=pltpu.PrefetchScalarGridSpec(
            num_scalar_prefetch=0,
            grid=grid,
            in_specs=[
                pl.BlockSpec((bt, S, D), lambda i: (i, 0, 0)),  # token emb tile
                pl.BlockSpec((S, D), lambda i: (0, 0)),         # pos emb (shared over batch)
                pl.BlockSpec((1, D), lambda i: (0, 0)),          # gamma
                pl.BlockSpec((1, D), lambda i: (0, 0)),          # beta
            ],
            out_specs=pl.BlockSpec((bt, S, D), lambda i: (i, 0, 0)),
        ),
        input_output_aliases={0: 0},   # write LN output over the gathered tok buffer
        cost_estimate=cost,
        compiler_params=pltpu.CompilerParams(
            dimension_semantics=("parallel",),
            vmem_limit_bytes=vmem_limit,
        ),
    )(tok, pos, gamma.reshape(1, D), beta.reshape(1, D))


# ---------------------------------------------------------------------------
# Parameters + forward (mirrors EmbeddingLayer.forward)
# ---------------------------------------------------------------------------
def init_params(vocab_size, key, maxlen=MAXLEN, d_model=D_MODEL):
    k_tok, k_pos = jax.random.split(key)
    return {
        # nn.Embedding default init is N(0, 1)
        "tok_emb": jax.random.normal(k_tok, (vocab_size, d_model), jnp.float32),
        "pos_emb": jax.random.normal(k_pos, (maxlen, d_model), jnp.float32),
        "ln_g": jnp.ones((d_model,), jnp.float32),
        "ln_b": jnp.zeros((d_model,), jnp.float32),
    }


def embedding_layer_forward(params, input_ids):
    """input_ids: (B, S) int32 -> (B, S, d_model)"""
    B, S = input_ids.shape

    # Data-dependent row gather stays in XLA (not expressible as a static BlockSpec tile).
    tok = jnp.take(params["tok_emb"], input_ids, axis=0)            # (B, S, D)
    pos = jax.lax.slice_in_dim(params["pos_emb"], 0, S, axis=0)     # (S, D), shared over batch

    out = fused_embed_add_layernorm(tok, pos, params["ln_g"], params["ln_b"])
    # TODO(synk): nn.Dropout(0.3) is treated as identity (eval-mode forward).
    return out


def _reference_forward(params, input_ids):
    """Plain-JAX reference for correctness checking."""
    B, S = input_ids.shape
    x = params["tok_emb"][input_ids] + params["pos_emb"][jnp.arange(S)][None]
    mean = jnp.mean(x, axis=-1, keepdims=True)
    var = jnp.mean((x - mean) ** 2, axis=-1, keepdims=True)
    y = (x - mean) * jax.lax.rsqrt(var + LN_EPS)
    return y * params["ln_g"] + params["ln_b"]


# ---------------------------------------------------------------------------
if __name__ == "__main__":
    key = jax.random.PRNGKey(0)
    k_param, k_ids = jax.random.split(key)

    VOCAB = 50
    B, S = 2, 8

    params = init_params(VOCAB, k_param)
    input_ids = jax.random.randint(k_ids, (B, S), 1, VOCAB, dtype=jnp.int32)
    input_ids = input_ids.at[1, 6:].set(0)   # some padding tokens, as in the finetune data

    fwd = jax.jit(embedding_layer_forward)
    out = fwd(params, input_ids)
    jax.block_until_ready(out)

    assert out.shape == (B, S, D_MODEL), out.shape

    ref = _reference_forward(params, input_ids)
    assert jnp.allclose(out, ref, atol=1e-4, rtol=1e-4), "mismatch vs reference LayerNorm"

    print("KERNEL_OK")
</pallas_src>

<mosaic_0001>
module attributes {stable_mosaic.version = 11 : i64} {
  func.func @_embed_add_ln_kernel(%arg0: i32, %arg1: memref<1x8x768xf32, #tpu.memory_space<vmem>>, %arg2: memref<8x768xf32, #tpu.memory_space<vmem>>, %arg3: memref<1x768xf32, #tpu.memory_space<vmem>>, %arg4: memref<1x768xf32, #tpu.memory_space<vmem>>, %arg5: memref<1x8x768xf32, #tpu.memory_space<vmem>>) attributes {dimension_semantics = [#tpu.dimension_semantics<parallel>], iteration_bounds = array<i64: 2>, scalar_prefetch = 0 : i64, scratch_operands = 0 : i64, tpu.core_type = #tpu.core_type<tc>, window_params = [{transform_indices = @transform_0, window_bounds = array<i64: 1, 8, 768>}, {pipeline_mode = #tpu.pipeline_mode<synchronous>, transform_indices = @transform_1, window_bounds = array<i64: 8, 768>}, {pipeline_mode = #tpu.pipeline_mode<synchronous>, transform_indices = @transform_2, window_bounds = array<i64: 1, 768>}, {pipeline_mode = #tpu.pipeline_mode<synchronous>, transform_indices = @transform_3, window_bounds = array<i64: 1, 768>}, {transform_indices = @transform_4, window_bounds = array<i64: 1, 8, 768>}]} {
    %c0 = arith.constant 0 : index
    %c0_0 = arith.constant 0 : index
    %c0_1 = arith.constant 0 : index
    %0 = vector.load %arg1[%c0, %c0_0, %c0_1] : memref<1x8x768xf32, #tpu.memory_space<vmem>>, vector<1x8x768xf32>
    %c0_2 = arith.constant 0 : index
    %c0_3 = arith.constant 0 : index
    %1 = vector.load %arg2[%c0_2, %c0_3] : memref<8x768xf32, #tpu.memory_space<vmem>>, vector<8x768xf32>
    %2 = vector.shape_cast %1 : vector<8x768xf32> to vector<1x8x768xf32>
    %3 = arith.addf %0, %2 : vector<1x8x768xf32>
    %cst = arith.constant dense<0.000000e+00> : vector<1x8xf32>
    %4 = vector.multi_reduction <add>, %3, %cst [2] : vector<1x8x768xf32> to vector<1x8xf32>
    %5 = vector.shape_cast %4 : vector<1x8xf32> to vector<1x8x1xf32>
    %cst_4 = arith.constant 7.680000e+02 : f32
    %6 = vector.broadcast %cst_4 : f32 to vector<1x8x1xf32>
    %7 = arith.divf %5, %6 : vector<1x8x1xf32>
    %8 = vector.broadcast %7 : vector<1x8x1xf32> to vector<1x8x768xf32>
    %9 = arith.subf %3, %8 : vector<1x8x768xf32>
    %10 = arith.mulf %9, %9 : vector<1x8x768xf32>
    %cst_5 = arith.constant dense<0.000000e+00> : vector<1x8xf32>
    %11 = vector.multi_reduction <add>, %10, %cst_5 [2] : vector<1x8x768xf32> to vector<1x8xf32>
    %12 = vector.shape_cast %11 : vector<1x8xf32> to vector<1x8x1xf32>
    %cst_6 = arith.constant 7.680000e+02 : f32
    %13 = vector.broadcast %cst_6 : f32 to vector<1x8x1xf32>
    %14 = arith.divf %12, %13 : vector<1x8x1xf32>
    %cst_7 = arith.constant 9.99999974E-6 : f32
    %15 = vector.broadcast %cst_7 : f32 to vector<1x8x1xf32>
    %16 = arith.addf %14, %15 : vector<1x8x1xf32>
    %17 = math.rsqrt %16 : vector<1x8x1xf32>
    %18 = vector.broadcast %17 : vector<1x8x1xf32> to vector<1x8x768xf32>
    %19 = arith.mulf %9, %18 : vector<1x8x768xf32>
    %c0_8 = arith.constant 0 : index
    %c0_9 = arith.constant 0 : index
    %20 = vector.load %arg3[%c0_8, %c0_9] : memref<1x768xf32, #tpu.memory_space<vmem>>, vector<1x768xf32>
    %21 = vector.shape_cast %20 : vector<1x768xf32> to vector<1x1x768xf32>
    %22 = vector.broadcast %21 : vector<1x1x768xf32> to vector<1x8x768xf32>
    %23 = arith.mulf %19, %22 : vector<1x8x768xf32>
    %c0_10 = arith.constant 0 : index
    %c0_11 = arith.constant 0 : index
    %24 = vector.load %arg4[%c0_10, %c0_11] : memref<1x768xf32, #tpu.memory_space<vmem>>, vector<1x768xf32>
    %25 = vector.shape_cast %24 : vector<1x768xf32> to vector<1x1x768xf32>
    %26 = vector.broadcast %25 : vector<1x1x768xf32> to vector<1x8x768xf32>
    %27 = arith.addf %23, %26 : vector<1x8x768xf32>
    %c0_12 = arith.constant 0 : index
    %c0_13 = arith.constant 0 : index
    %c0_14 = arith.constant 0 : index
    %28 = vector.load %arg5[%c0_12, %c0_13, %c0_14] : memref<1x8x768xf32, #tpu.memory_space<vmem>>, vector<1x8x768xf32>
    tpu.vector_store %arg5[%c0_12, %c0_13, %c0_14], %27 {strides = array<i32>} : memref<1x8x768xf32, #tpu.memory_space<vmem>>, vector<1x8x768xf32>,
    return
  }
  func.func @transform_0(%arg0: i32) -> (i32, i32, i32) {
    %c0_i32 = arith.constant 0 : i32
    %c0_i32_0 = arith.constant 0 : i32
    %c0_i32_1 = arith.constant 0 : i32
    return %arg0, %c0_i32, %c0_i32_0 : i32, i32, i32
  }
  func.func @transform_1(%arg0: i32) -> (i32, i32) {
    %c0_i32 = arith.constant 0 : i32
    %c0_i32_0 = arith.constant 0 : i32
    %c0_i32_1 = arith.constant 0 : i32
    return %c0_i32, %c0_i32_0 : i32, i32
  }
  func.func @transform_2(%arg0: i32) -> (i32, i32) {
    %c0_i32 = arith.constant 0 : i32
    %c0_i32_0 = arith.constant 0 : i32
    %c0_i32_1 = arith.constant 0 : i32
    return %c0_i32, %c0_i32_0 : i32, i32
  }
  func.func @transform_3(%arg0: i32) -> (i32, i32) {
    %c0_i32 = arith.constant 0 : i32
    %c0_i32_0 = arith.constant 0 : i32
    %c0_i32_1 = arith.constant 0 : i32
    return %c0_i32, %c0_i32_0 : i32, i32
  }
  func.func @transform_4(%arg0: i32) -> (i32, i32, i32) {
    %c0_i32 = arith.constant 0 : i32
    %c0_i32_0 = arith.constant 0 : i32
    %c0_i32_1 = arith.constant 0 : i32
    return %arg0, %c0_i32, %c0_i32_0 : i32, i32, i32
  }
}

</mosaic_0001>

<bundles_post_ra>
// kernel: embedding_layer_forward.1
= control target key start
LH: loop header
LB: loop body
LE: loop exit
PB: predicated region body
PF: predicated region fallthrough
CT: control target
= control target key end

     0   :  { %9 = vsyncpa [#allocation3], 0  ;;  %s804_s0 = inlined_call_operand.hbm [shape: f32[2,8,768], index: 0, kind: input, shape index: {}, may-alias: {0,4}]   ;;  %s805_s1 = inlined_call_operand.vmem [shape: f32[8,768], index: 1, kind: input, shape index: {}]   ;;  %s806_s2 = inlined_call_operand.vmem [shape: f32[1,768], index: 2, kind: input, shape index: {}]   ;;  %s807_s3 = inlined_call_operand.vmem [shape: f32[1,768], index: 3, kind: input, shape index: {}]   ;;  %s808_s4 = inlined_call_operand.hbm [shape: f32[2,8,768], index: 4, kind: output, shape index: {}, may-alias: {0,4}]  }
   0x1   :  { %11 = vsyncpa [#allocation3 + $0x1], 0 }
   0x2   :  { %12 = vsyncpa [#allocation4], 0 }
   0x3   :  { %14 = vsyncpa [#allocation4 + $0x1], 0  ;;  %s621_s15 = smov 0   ;;  %s623_s16 = smov 0  }
   0x4   :  { %s625_s17 = smov 0   ;;  %s627_s18 = smov 0  }
   0x5 LB: > { %s642_s19 = sadd.s32 4294967295, %s592_s18   ;;  %s436_s20 = sadd.s32 4294967294, %s592_s18   ;;  %s592_s18 = sphi %s627_s18, %s822_s18   ;;  %s588_s17 = sphi %s625_s17, %s821_s17   ;;  %s584_s16 = sphi %s623_s16, %s820_s16   ;;  %s580_s15 = sphi %s621_s15, %s819_s15  }
   0x6   : > { %s646_s21 = sadd.s32 1, %s592_s18   ;;  %s27_s22 = sadd.s32 1, %s588_s17 }
   0x7   : > { %s24_s23 = ssub.s32 %s592_s18, %s646_s21  ;;  %p34_p0 = scmp.ne.s32.totalorder %s588_s17, %s584_s16 }
   0x8   : > { %p25_p1 = scmp.eq.s32.totalorder %s24_s23, 0  ;;  %p35_p2 = scmp.eq.s32.totalorder %s592_s18, 0 }
   0x9   : > { %p40_p3 = scmp.ne.s32.totalorder %s584_s16, %s580_s15  ;;  %p41_p4 = scmp.eq.s32.totalorder %s642_s19, 0 }
   0xa   : > { %s658_s24 = scalar_select %p25_p1, %s588_s17, %s27_s22  }
   0xb   : > { %p36_p5 = por %p35_p2, %p34_p0  ;;  %p660_p6 = por %p41_p4, %p40_p3 }
   0xc   : > { %p127_p7 = scmp.eq.s32.totalorder %s642_s19, 1  ;;  %p133_p8 = scmp.eq.s32.totalorder %s436_s20, 1 }
   0xd   : > { %p460_p10 = scmp.lt.s32.totalorder %s592_s18, 2  ;;  %s162_s28 = sand.u32 1, %s588_s17  }
   0xe   : > { %p667_p11 = por %p127_p7, %p34_p0  ;;  %p671_p12 = por %p133_p8, %p40_p3 }
   0xf   : > { %s445_s29 = smul.u32 768, %s592_s18  ;;  %p682_p13 = pnand %p460_p10, %p36_p5 }
  0x10   : > { %s811_s26 = scalar_select %p667_p11, 1, 0 }
  0x11   : > { %s812_s27 = scalar_select %p671_p12, 1, 0 }
  0x12   : > { %s444_s30 = smul.u32 48, %s162_s28  ;;  %s680_s7 = scalar_lea.hbm %s804_s0, %s445_s29 }
  0x13   : > { %s163_s11 = scalar_lea.sflag [#allocation3], %s162_s28  ;;  %s496_s12 = scalar_lea.hbm %s680_s7, 768 }
  0x14   : > { %s166_s9 = scalar_lea.vmem [#allocation2], %s444_s30  ;;  %p497_p2 = scmp.ne.s32.totalorder %s680_s7, %s496_s12 }
  0x15   : > { %s174_s10 = sshll.u32 %s166_s9, 4  ;;  %p498_p3 = pneg %p682_p13  ;;  %s687_s10 = int_to_ptr.vmem [resolvable:$true] %s174_s10 }
  0x16   : > { %s501_s20 = scalar_lea.hbm %s804_s0, 1536  ;;  %p502_p7 = scmp.lt.u32.totalorder %s680_s7, %s804_s0 }
  0x17   : > { %p499_p4 = pnand %p498_p3, %p497_p2  ;;  %p503_p8 = scmp.lt.u32.totalorder %s501_s20, %s496_s12 }
  0x18   : > { %p505_p9 = scmp.lt.u32.totalorder %s496_s12, %s680_s7 }
  0x19   : > { %p500_p5 = pneg %p499_p4  ;;  %p504_p10 = por %p503_p8, %p502_p7 }
  0x1b   : > { %p506_p0 = por %p505_p9, %p504_p10 }
  0x1d   : > { %p507_p1 = pnand %p506_p0, %p500_p5 }
  0x1f   : > { %510 = shalt.err (!%p507_p1)
}
  0x20   : > { %s511_s28 = scalar_lea.vmem %s687_s10, 768  ;;  %s594_s29 = smov [#allocation2]  }
  0x21   : > { %p512_p2 = scmp.ne.s32.totalorder %s687_s10, %s511_s28  ;;  %s516_s30 = sshll.u32 %s594_s29, 4  ;;  %s517_s30 = int_to_ptr.vmem [resolvable:$false] %s516_s30 }
  0x22   : > { %s518_s5 = scalar_lea.vmem %s517_s30, 1536  ;;  %p519_p11 = scmp.lt.s32.totalorder %s687_s10, %s517_s30 }
  0x23   : > { %p514_p4 = pnand %p512_p2, %p498_p3  ;;  %p520_p7 = scmp.lt.s32.totalorder %s518_s5, %s511_s28 }
  0x25   : > { %p515_p12 = pneg %p514_p4  ;;  %p521_p8 = por %p520_p7, %p519_p11 }
  0x27   : > { %p522_p9 = pnand %p521_p8, %p515_p12 }
  0x29   : > { %525 = shalt.err (!%p522_p9)
}
  0x2a   : > { %455 = dma.hbm_to_vmem [thread:$0]  (!%p682_p13), %s680_s7, 768, %s687_s10, %s163_s11  }
  0x2b   : > { %p814_p0 = scmp.lt.s32.totalorder %s592_s18, 3  ;;  %p815_p1 = scmp.ge.s32.totalorder %s592_s18, 1 }
  0x2d   : > { %p180_p3 = pnand %p815_p1, %p814_p0 }
  0x2e   : > { %s720_s6 = sand.u32 (!%p180_p3), 1, %s584_s16  }
  0x2f   : > { %183 = sbr.rel (%p180_p3) target bundleno = 407 (0x197), region = 36  ;;  %s186_s12 = scalar_lea.sflag (!%p180_p3), [#allocation3], %s720_s6 }
  0x30   : > { %s446_s9 = smul.u32 (!%p180_p3), 48, %s720_s6 }
  0x32   : > { %s189_s8 = scalar_lea.vmem (!%p180_p3), [#allocation2], %s446_s9 }
  0x36   : > { %571 = dma.done.wait (%p660_p6), %s186_s12, 768  }
  0x37   : > { %573 = vsyncadd (%p660_p6), %s186_s12, 4294966528  ;;  %v214_v0 = vld [vmem:[%s189_s8] sm:$0xff]  ;;  %v215_v1 = vld [vmem:[%s189_s8 + $0x8] sm:$0xff]  ;;  %v271_v44 = vlaneseq  ;;  %s447_s10 = smul.u32 768, %s642_s19  ;;  %s213_s11 = scalar_lea.vmem [#allocation5], %s446_s9 }
  0x38   : > { %v216_v2 = vld [vmem:[%s189_s8 + $0x10] sm:$0xff]  ;;  %v217_v3 = vld [vmem:[%s189_s8 + $0x18] sm:$0xff]  ;;  %v218_v11 = vld [vmem:[%s189_s8 + $0x20] sm:$0xff]  ;;  %s366_s13 = sshll.u32 %s213_s11, 4  ;;  %s352_s9 = scalar_lea.sflag [#allocation4], %s720_s6  ;;  %s762_s13 = int_to_ptr.vmem [resolvable:$true] %s366_s13 }
  0x39   : > { %v220_v4 = vld [vmem:[%s805_s1] sm:$0xff]  ;;  %v221_v5 = vld [vmem:[%s805_s1 + $0x8] sm:$0xff]  ;;  %v222_v6 = vld [vmem:[%s805_s1 + $0x10] sm:$0xff]  ;;  %v272_v46 = vshrl.u32 %v271_v44, 7  ;;  %s760_s19 = scalar_lea.hbm %s808_s4, %s447_s10  ;;  %s526_s22 = scalar_lea.vmem %s762_s13, 768 }
  0x3a   : > { %v223_v7 = vld [vmem:[%s805_s1 + $0x18] sm:$0xff]  ;;  %v226_v8 = vadd.f32 %v220_v4, %v214_v0  ;;  %v227_v9 = vadd.f32 %v221_v5, %v215_v1  ;;  %v228_v10 = vadd.f32 %v222_v6, %v216_v2  ;;  %v224_v12 = vld [vmem:[%s805_s1 + $0x20] sm:$0xff]  ;;  %v225_v16 = vld [vmem:[%s805_s1 + $0x28] sm:$0xff]  ;;  %p527_p6 = scmp.ne.s32.totalorder %s762_s13, %s526_s22  ;;  %p816_p11 = scmp.ne.s32.totalorder %s811_s26, 0 }
  0x3b   : > { %v229_v13 = vadd.f32 %v223_v7, %v217_v3  ;;  %v219_v15 = vld [vmem:[%s189_s8 + $0x28] sm:$0xff]  ;;  %v230_v17 = vadd.f32 %v224_v12, %v218_v11  ;;  %v273_v47 = vsub.s32 0, %v272_v46  ;;  %v277_v48 = vsub.s32 1, %v272_v46  ;;  %v269_v49 = vld [vmem:[%s806_s2] sm:$0x3f]  ;;  %s595_s23 = smov [#allocation5]  }
  0x3c   : > { %v232_v14 = vadd.f32 %v227_v9, %v226_v8  ;;  %v231_v19 = vadd.f32 %v225_v16, %v219_v15  ;;  %v281_v50 = vsub.s32 2, %v272_v46  ;;  %v285_v51 = vsub.s32 3, %v272_v46  ;;  %v307_v54 = vld [vmem:[%s807_s3] sm:$0x3f]  ;;  %p528_p12 = pnand %p527_p6, %p816_p11  ;;  %s530_s25 = sshll.u32 %s595_s23, 4  ;;  %s531_s25 = int_to_ptr.vmem [resolvable:$false] %s530_s25 }
  0x3d   : > { %v289_v52 = vsub.s32 4, %v272_v46  ;;  %v293_v53 = vsub.s32 5, %v272_v46  ;;  %v274_v55 = vrot.slane %v269_v49, %v273_v47  ;;  %v278_v56 = vrot.slane %v269_v49, %v277_v48  ;;  %s532_s28 = scalar_lea.vmem %s531_s25, 1536  ;;  %p533_p5 = scmp.lt.s32.totalorder %s762_s13, %s531_s25 }
  0x3e   : > { %v233_v18 = vadd.f32 %v232_v14, %v228_v10  ;;  %v282_v57 = vrot.slane %v269_v49, %v281_v50  ;;  %v286_v58 = vrot.slane %v269_v49, %v285_v51  ;;  %v312_v62 = vrot.slane %v307_v54, %v273_v47  ;;  %p529_p13 = pneg %p528_p12  ;;  %p534_p10 = scmp.lt.s32.totalorder %s532_s28, %s526_s22 }
  0x3f   : > { %v290_v59 = vrot.slane %v269_v49, %v289_v52  ;;  %v294_v60 = vrot.slane %v269_v49, %v293_v53  ;;  %v316_v63 = vrot.slane %v307_v54, %v277_v48  ;;  %v320_v0 = vrot.slane %v307_v54, %v281_v50 }
  0x40   : > { %v234_v20 = vadd.f32 %v233_v18, %v229_v13  ;;  %v324_v1 = vrot.slane %v307_v54, %v285_v51  ;;  %p535_p2 = por %p534_p10, %p533_p5 }
  0x42   : > { %v235_v21 = vadd.f32 %v234_v20, %v230_v17  ;;  %p536_p4 = pnand %p535_p2, %p529_p13 }
  0x44   : > { %v236_v22 = vadd.f32 %v235_v21, %v231_v19 }
  0x46   : > { %237 = vadd.xlane.f32.xlu0 %v236_v22 }
  0xd3   : > { %v238_v23 = vpop.xlane.xlu0 %237 }
  0xd4   : > { %v240_v24 = vmul.f32 0.0013020834, %v238_v23 }
  0xd6   : > { %v241_v25 = vsub.f32 %v226_v8, %v240_v24  ;;  %v242_v26 = vsub.f32 %v227_v9, %v240_v24  ;;  %v243_v27 = vsub.f32 %v228_v10, %v240_v24  ;;  %v244_v28 = vsub.f32 %v229_v13, %v240_v24 }
  0xd7   : > { %v245_v31 = vsub.f32 %v230_v17, %v240_v24  ;;  %v246_v34 = vsub.f32 %v231_v19, %v240_v24  ;;  %v328_v8 = vrot.slane %v307_v54, %v289_v52  ;;  %v332_v9 = vrot.slane %v307_v54, %v293_v53 }
  0xd8   : > { %v247_v29 = vmul.f32 %v241_v25, %v241_v25  ;;  %v248_v30 = vmul.f32 %v242_v26, %v242_v26  ;;  %v249_v32 = vmul.f32 %v243_v27, %v243_v27  ;;  %v250_v35 = vmul.f32 %v244_v28, %v244_v28 }
  0xd9   : > { %v251_v37 = vmul.f32 %v245_v31, %v245_v31  ;;  %v252_v39 = vmul.f32 %v246_v34, %v246_v34 }
  0xda   : > { %v253_v33 = vadd.f32 %v248_v30, %v247_v29 }
  0xdc   : > { %v254_v36 = vadd.f32 %v253_v33, %v249_v32 }
  0xde   : > { %v255_v38 = vadd.f32 %v254_v36, %v250_v35 }
  0xe0   : > { %v256_v40 = vadd.f32 %v255_v38, %v251_v37 }
  0xe2   : > { %v257_v41 = vadd.f32 %v256_v40, %v252_v39 }
  0xe4   : > { %258 = vadd.xlane.f32.xlu0 %v257_v41 }
 0x171   : > { %v259_v42 = vpop.xlane.xlu0 %258 }
 0x172   : > { %v260_v43 = vmul.f32 0.0013020834, %v259_v42 }
 0x174   : > { %v261_v45 = vadd.f32 1e-05, %v260_v43 }
 0x176   : > { %494 = vrsqrt.f32 %v261_v45 }
 0x180   : > { %v495_v61 = vpop.eup %494 }
 0x181   : > { %v263_v2 = vmul.f32 %v495_v61, %v241_v25  ;;  %v264_v3 = vmul.f32 %v495_v61, %v242_v26  ;;  %v265_v4 = vmul.f32 %v495_v61, %v243_v27  ;;  %v266_v5 = vmul.f32 %v495_v61, %v244_v28 }
 0x182   : > { %v267_v6 = vmul.f32 %v495_v61, %v245_v31  ;;  %v268_v7 = vmul.f32 %v495_v61, %v246_v34 }
 0x183   : > { %v301_v10 = vmul.f32 %v274_v55, %v263_v2  ;;  %v302_v11 = vmul.f32 %v278_v56, %v264_v3  ;;  %v303_v12 = vmul.f32 %v282_v57, %v265_v4  ;;  %v304_v13 = vmul.f32 %v286_v58, %v266_v5 }
 0x184   : > { %v305_v14 = vmul.f32 %v290_v59, %v267_v6  ;;  %v306_v15 = vmul.f32 %v294_v60, %v268_v7 }
 0x185   : > { %v339_v16 = vadd.f32 %v312_v62, %v301_v10  ;;  %v340_v17 = vadd.f32 %v316_v63, %v302_v11  ;;  %v341_v18 = vadd.f32 %v320_v0, %v303_v12  ;;  %v342_v19 = vadd.f32 %v324_v1, %v304_v13 }
 0x186   : > { %v343_v20 = vadd.f32 %v328_v8, %v305_v14  ;;  %v344_v21 = vadd.f32 %v332_v9, %v306_v15 }
 0x187   : > { %345 = vst [vmem:[%s213_s11] sm:$0xff] %v339_v16  ;;  %346 = vst [vmem:[%s213_s11 + $0x8] sm:$0xff] %v340_v17 }
 0x188   : > { %347 = vst [vmem:[%s213_s11 + $0x10] sm:$0xff] %v341_v18  ;;  %348 = vst [vmem:[%s213_s11 + $0x18] sm:$0xff] %v342_v19 }
 0x189   : > { %349 = vst [vmem:[%s213_s11 + $0x20] sm:$0xff] %v343_v20  ;;  %350 = vst [vmem:[%s213_s11 + $0x28] sm:$0xff] %v344_v21 }
 0x18a   : > { %539 = shalt.err (!%p536_p4)
}
 0x18b   : > { %s540_s6 = scalar_lea.hbm %s760_s19, 768  ;;  %s544_s5 = scalar_lea.hbm %s808_s4, 1536 }
 0x18c   : > { %p541_p7 = scmp.ne.s32.totalorder %s760_s19, %s540_s6  ;;  %p545_p0 = scmp.lt.u32.totalorder %s760_s19, %s808_s4 }
 0x18d   : > { %p546_p1 = scmp.lt.u32.totalorder %s544_s5, %s540_s6  ;;  %p548_p6 = scmp.lt.u32.totalorder %s540_s6, %s760_s19 }
 0x18e   : > { %p542_p8 = pnand %p541_p7, %p816_p11 }
 0x18f   : > { %p547_p3 = por %p546_p1, %p545_p0 }
 0x190   : > { %p543_p9 = pneg %p542_p8 }
 0x191   : > { %p549_p12 = por %p548_p6, %p547_p3 }
 0x193   : > { %p550_p13 = pnand %p549_p12, %p543_p9 }
 0x195   : > { %553 = shalt.err (!%p550_p13)
}
 0x196   : > { %450 = dma.vmem_to_hbm [thread:$0]  (%p816_p11), %s762_s13, 768, %s760_s19, %s352_s9  }
 0x197 PF: > { %s378_s7 = sand.u32 1, %s580_s15   ;;  %p817_p5 = scmp.ne.s32.totalorder %s812_s27, 0 }
 0x198   : > { %p818_p10 = scmp.ge.s32.totalorder %s592_s18, 2  ;;  %s379_s10 = scalar_lea.sflag [#allocation4], %s378_s7 }
 0x19a   : > { %p457_p2 = pnand %p818_p10, %p817_p5 }
 0x19c   : > { %575 = dma.done.wait (!%p457_p2), %s379_s10, 768  }
 0x19d   : > { %577 = vsyncadd (!%p457_p2), %s379_s10, 4294966528  ;;  %p17_p4 = scmp.ge.s32.totalorder %s646_s21, 4   ;;  %s819_s15 = smov %s584_s16 }
 0x19e   : > { %s820_s16 = smov %s588_s17  ;;  %s821_s17 = smov %s658_s24 }
 0x19f   : > { %s822_s18 = smov %s646_s21  ;;  %19 = sbr.rel (!%p17_p4) target bundleno = 5 (0x5), region = 81 }
 0x1a6   :  { %384 = vsyncpa [#allocation3], 1 }
 0x1a7   :  { %386 = vsyncpa [#allocation3 + $0x1], 1 }
 0x1a8   :  { %387 = vsyncpa [#allocation4], 1 }
 0x1a9   :  { %389 = vsyncpa [#allocation4 + $0x1], 1 }

</bundles_post_ra>
